<compile_context>
chip_gen: v6e
topology: v6e:2x2x1
jax: 0.10.0
libtpu: 0.0.40
codegen_flags: <defaults>
</compile_context>

<pallas_src>
import functools

import jax
import jax.numpy as jnp
from jax import lax
from jax.experimental import pallas as pl
from jax.experimental.pallas import tpu as pltpu

_LANES = 128
_NCORES = 2   # megacore split on v7x; harmless serial iteration on v5e/v6e


def _round_up(x, m):
    return ((x + m - 1) // m) * m


# ----------------------------------------------------------------------------
# Streaming global min/max kernel over a (rows, 128) lane-dense view.
# ----------------------------------------------------------------------------
def _make_info_kernel(*, tm, sub, nsub, rows_total, steps, need_mask,
                      lo_fill, hi_fill, dtype):
    def kernel(x_ref, mn_ref, mx_ref, mn_acc, mx_acc):
        c = pl.program_id(0)          # parallel (core) axis
        s = pl.program_id(1)          # streaming / reduction axis

        @pl.when(s == 0)
        def _():
            mn_acc[...] = jnp.full((sub, _LANES), hi_fill, dtype)
            mx_acc[...] = jnp.full((sub, _LANES), lo_fill, dtype)

        blk = x_ref[...]              # (tm, 128), native dtype, lane-dense

        def fold(lo_blk, hi_blk):
            # Pure elementwise (VPU) folds into a single vreg-sized tile;
            # no cross-lane work until the final host-side jnp.min/max.
            mn_acc[...] = jnp.minimum(
                mn_acc[...], jnp.min(lo_blk.reshape(nsub, sub, _LANES), axis=0))
            mx_acc[...] = jnp.maximum(
                mx_acc[...], jnp.max(hi_blk.reshape(nsub, sub, _LANES), axis=0))

        if need_mask:
            # Compiled in only when rows_total % tm != 0 or the (ncores, steps)
            # grid has padded (fully out-of-range) steps.
            row_start = (c * steps + s) * tm
            is_edge = row_start + tm > rows_total

            @pl.when(jnp.logical_not(is_edge))
            def _():
                fold(blk, blk)

            @pl.when(is_edge)
            def _():
                row_ids = lax.broadcasted_iota(jnp.int32, (tm, _LANES), 0) + row_start
                valid = row_ids < rows_total
                fold(jnp.where(valid, blk, jnp.full_like(blk, hi_fill)),
                     jnp.where(valid, blk, jnp.full_like(blk, lo_fill)))
        else:
            fold(blk, blk)

        @pl.when(s == steps - 1)
        def _():
            mn_ref[...] = mn_acc[...]
            mx_ref[...] = mx_acc[...]

    return kernel


@functools.partial(jax.jit, static_argnames=("tile_rows",))
def _info_minmax(x, *, tile_rows=2048):
    """Global (min, max) of x in its native dtype via one streaming HBM pass."""
    dtype = x.dtype
    flat = x.reshape(-1)              # free (row-major metadata reshape)
    n = flat.shape[0]

    if jnp.issubdtype(dtype, jnp.floating):
        lo_fill, hi_fill = float("-inf"), float("inf")
    elif jnp.issubdtype(dtype, jnp.integer):
        ii = jnp.iinfo(dtype)
        lo_fill, hi_fill = int(ii.min), int(ii.max)
    else:
        # TODO(synk): bool/complex inputs fall back to XLA's reduction.
        return jnp.min(flat), jnp.max(flat)

    n_main = (n // _LANES) * _LANES
    if n_main == 0:                   # tiny tensor: no kernel needed
        return jnp.min(flat), jnp.max(flat)

    tail_mn = tail_mx = None
    if n_main < n:
        # TODO(synk): sizes that are not a multiple of 128 pay one extra
        # prefix-copy pass (the <128-element tail is reduced outside).
        tail = lax.slice(flat, (n_main,), (n,))
        tail_mn, tail_mx = jnp.min(tail), jnp.max(tail)
        main = lax.slice(flat, (0,), (n_main,))
    else:
        main = flat                   # no copy on the common path

    rows = n_main // _LANES
    x2d = main.reshape(rows, _LANES)  # free reshape

    sub = max(8, 32 // dtype.itemsize)                # native sublane packing
    tm = max(sub, min(int(tile_rows) // sub * sub, _round_up(rows, sub)))
    nsub = tm // sub
    total_blocks = pl.cdiv(rows, tm)
    ncores = min(_NCORES, total_blocks)
    steps = pl.cdiv(total_blocks, ncores)
    need_mask = (ncores * steps != total_blocks) or (rows % tm != 0)
    last_block = total_blocks - 1

    kernel = _make_info_kernel(tm=tm, sub=sub, nsub=nsub, rows_total=rows,
                               steps=steps, need_mask=need_mask,
                               lo_fill=lo_fill, hi_fill=hi_fill, dtype=dtype)

    mn_parts, mx_parts = pl.pallas_call(
        kernel,
        out_shape=(
            jax.ShapeDtypeStruct((ncores, sub, _LANES), dtype),
            jax.ShapeDtypeStruct((ncores, sub, _LANES), dtype),
        ),
        grid_spec=pltpu.PrefetchScalarGridSpec(
            num_scalar_prefetch=0,
            grid=(ncores, steps),
            in_specs=[pl.BlockSpec(
                (tm, _LANES),
                lambda c, s: (jnp.minimum(c * steps + s, last_block), 0))],
            out_specs=[
                pl.BlockSpec((None, sub, _LANES), lambda c, s: (c, 0, 0)),
                pl.BlockSpec((None, sub, _LANES), lambda c, s: (c, 0, 0)),
            ],
            scratch_shapes=[
                pltpu.VMEM((sub, _LANES), dtype),     # running min
                pltpu.VMEM((sub, _LANES), dtype),     # running max
            ],
        ),
        compiler_params=pltpu.CompilerParams(
            dimension_semantics=("parallel", "arbitrary"),
            vmem_limit_bytes=32 * 1024 * 1024,
        ),
    )(x2d)

    mn = jnp.min(mn_parts)
    mx = jnp.max(mx_parts)
    if tail_mn is not None:
        mn = jnp.minimum(mn, tail_mn)
        mx = jnp.maximum(mx, tail_mx)
    return mn, mx


# ----------------------------------------------------------------------------
# Info module (host-side counter / print state mirrors the PyTorch module).
# ----------------------------------------------------------------------------
class Info:
    """JAX/Pallas port of torchmore2.layers.Info: identity with periodic stats."""

    def __init__(self, info="", every=1000000, log_fn=print):
        self.info = info
        self.count = 0
        self.every = every
        self.log_fn = log_fn          # host-side print hook

    def __call__(self, x):
        return self.forward(x)

    def forward(self, x):
        if self.count % self.every == 0:
            if x.size == 0:
                self.log_fn(("Info", self.info, tuple(x.shape),
                             float("nan"), float("nan")))
            else:
                mn, mx = _info_minmax(x)
                self.log_fn(("Info", self.info, tuple(x.shape),
                             float(mn), float(mx)))
        self.count += 1
        return x                      # pure identity: no copy, no kernel here

    def __repr__(self):
        return "Info {} ({} % {})".format(self.info, self.count, self.every)


# ----------------------------------------------------------------------------
if __name__ == "__main__":
    key = jax.random.PRNGKey(0)
    x = jax.random.normal(key, (2, 4, 16, 16), jnp.float32)

    logged = []
    info = Info(info="demo", every=1000000, log_fn=logged.append)

    y = info(x)
    jax.block_until_ready(y)

    # Forward is an identity (returns x itself, no device copy).
    assert y is x

    # Logged stats match the jnp reference.
    assert len(logged) == 1
    tag, name, shape, mn, mx = logged[0]
    assert tag == "Info" and name == "demo" and shape == tuple(x.shape)
    assert abs(mn - float(jnp.min(x))) < 1e-6
    assert abs(mx - float(jnp.max(x))) < 1e-6

    # Second call inside the `every` window: pure pass-through, no new log.
    y2 = info(x)
    assert y2 is x and len(logged) == 1

    # Ragged size (tail < 128 elements + partial block rows) exercises masking.
    x2 = jax.random.normal(jax.random.PRNGKey(1), (7, 100), jnp.float32)
    mn2, mx2 = _info_minmax(x2)
    jax.block_until_ready((mn2, mx2))
    assert bool(jnp.isclose(mn2, jnp.min(x2)))
    assert bool(jnp.isclose(mx2, jnp.max(x2)))

    # Multi-block + 2-way parallel axis + clamped padded step (small tile).
    x3 = jax.random.normal(jax.random.PRNGKey(2), (40, 1280), jnp.float32)
    mn3, mx3 = _info_minmax(x3, tile_rows=64)
    jax.block_until_ready((mn3, mx3))
    assert bool(jnp.isclose(mn3, jnp.min(x3)))
    assert bool(jnp.isclose(mx3, jnp.max(x3)))

    # Integer inputs stay in native dtype (exact min/max, no f32 round trip).
    x4 = jax.random.randint(jax.random.PRNGKey(3), (16, 128),
                            -1000000, 1000000, dtype=jnp.int32)
    mn4, mx4 = _info_minmax(x4)
    jax.block_until_ready((mn4, mx4))
    assert int(mn4) == int(jnp.min(x4)) and int(mx4) == int(jnp.max(x4))

    print("KERNEL_OK")
</pallas_src>

<mosaic_0001>
module attributes {stable_mosaic.version = 11 : i64} {
  func.func @kernel(%arg0: i32, %arg1: i32, %arg2: memref<16x128xf32, #tpu.memory_space<vmem>>, %arg3: memref<1x8x128xf32, #tpu.memory_space<vmem>>, %arg4: memref<1x8x128xf32, #tpu.memory_space<vmem>>, %arg5: memref<8x128xf32, #tpu.memory_space<vmem>>, %arg6: memref<8x128xf32, #tpu.memory_space<vmem>>) attributes {dimension_semantics = [#tpu.dimension_semantics<parallel>, #tpu.dimension_semantics<arbitrary>], iteration_bounds = array<i64: 1, 1>, scalar_prefetch = 0 : i64, scratch_operands = 2 : i64, tpu.core_type = #tpu.core_type<tc>, window_params = [{transform_indices = @transform_0, window_bounds = array<i64: 16, 128>}, {transform_indices = @transform_1, window_bounds = array<i64: 1, 8, 128>}, {transform_indices = @transform_2, window_bounds = array<i64: 1, 8, 128>}]} {
    %c0_i32 = arith.constant 0 : i32
    %0 = arith.cmpi eq, %arg1, %c0_i32 : i32
    %1 = arith.extui %0 : i1 to i32
    %c0_i32_0 = arith.constant 0 : i32
    %2 = arith.cmpi ne, %1, %c0_i32_0 : i32
    scf.if %2 {
      %cst_13 = arith.constant 0x7F800000 : f32
      %17 = vector.broadcast %cst_13 : f32 to vector<8x128xf32>
      %c0_14 = arith.constant 0 : index
      %c0_15 = arith.constant 0 : index
      %18 = vector.load %arg5[%c0_14, %c0_15] : memref<8x128xf32, #tpu.memory_space<vmem>>, vector<8x128xf32>
      tpu.vector_store %arg5[%c0_14, %c0_15], %17 {strides = array<i32>} : memref<8x128xf32, #tpu.memory_space<vmem>>, vector<8x128xf32>,
      %cst_16 = arith.constant 0xFF800000 : f32
      %19 = vector.broadcast %cst_16 : f32 to vector<8x128xf32>
      %c0_17 = arith.constant 0 : index
      %c0_18 = arith.constant 0 : index
      %20 = vector.load %arg6[%c0_17, %c0_18] : memref<8x128xf32, #tpu.memory_space<vmem>>, vector<8x128xf32>
      tpu.vector_store %arg6[%c0_17, %c0_18], %19 {strides = array<i32>} : memref<8x128xf32, #tpu.memory_space<vmem>>, vector<8x128xf32>,
    } else {
    }
    %c0 = arith.constant 0 : index
    %c0_1 = arith.constant 0 : index
    %3 = vector.load %arg2[%c0, %c0_1] : memref<16x128xf32, #tpu.memory_space<vmem>>, vector<16x128xf32>
    %c0_2 = arith.constant 0 : index
    %c0_3 = arith.constant 0 : index
    %4 = vector.load %arg5[%c0_2, %c0_3] : memref<8x128xf32, #tpu.memory_space<vmem>>, vector<8x128xf32>
    %5 = vector.shape_cast %3 : vector<16x128xf32> to vector<2x8x128xf32>
    %cst = arith.constant dense<0x7F800000> : vector<8x128xf32>
    %6 = vector.multi_reduction <minimumf>, %5, %cst [0] : vector<2x8x128xf32> to vector<8x128xf32>
    %7 = arith.minimumf %4, %6 : vector<8x128xf32>
    %c0_4 = arith.constant 0 : index
    %c0_5 = arith.constant 0 : index
    %8 = vector.load %arg5[%c0_4, %c0_5] : memref<8x128xf32, #tpu.memory_space<vmem>>, vector<8x128xf32>
    tpu.vector_store %arg5[%c0_4, %c0_5], %7 {strides = array<i32>} : memref<8x128xf32, #tpu.memory_space<vmem>>, vector<8x128xf32>,
    %c0_6 = arith.constant 0 : index
    %c0_7 = arith.constant 0 : index
    %9 = vector.load %arg6[%c0_6, %c0_7] : memref<8x128xf32, #tpu.memory_space<vmem>>, vector<8x128xf32>
    %10 = vector.shape_cast %3 : vector<16x128xf32> to vector<2x8x128xf32>
    %cst_8 = arith.constant dense<0xFF800000> : vector<8x128xf32>
    %11 = vector.multi_reduction <maximumf>, %10, %cst_8 [0] : vector<2x8x128xf32> to vector<8x128xf32>
    %12 = arith.maximumf %9, %11 : vector<8x128xf32>
    %c0_9 = arith.constant 0 : index
    %c0_10 = arith.constant 0 : index
    %13 = vector.load %arg6[%c0_9, %c0_10] : memref<8x128xf32, #tpu.memory_space<vmem>>, vector<8x128xf32>
    tpu.vector_store %arg6[%c0_9, %c0_10], %12 {strides = array<i32>} : memref<8x128xf32, #tpu.memory_space<vmem>>, vector<8x128xf32>,
    %c0_i32_11 = arith.constant 0 : i32
    %14 = arith.cmpi eq, %arg1, %c0_i32_11 : i32
    %15 = arith.extui %14 : i1 to i32
    %c0_i32_12 = arith.constant 0 : i32
    %16 = arith.cmpi ne, %15, %c0_i32_12 : i32
    scf.if %16 {
      %c0_13 = arith.constant 0 : index
      %c0_14 = arith.constant 0 : index
      %17 = vector.load %arg5[%c0_13, %c0_14] : memref<8x128xf32, #tpu.memory_space<vmem>>, vector<8x128xf32>
      %c0_15 = arith.constant 0 : index
      %c0_16 = arith.constant 0 : index
      %c0_17 = arith.constant 0 : index
      %18 = vector.load %arg3[%c0_15, %c0_16, %c0_17] : memref<1x8x128xf32, #tpu.memory_space<vmem>>, vector<1x8x128xf32>
      %19 = vector.shape_cast %18 : vector<1x8x128xf32> to vector<8x128xf32>
      %20 = vector.shape_cast %17 : vector<8x128xf32> to vector<1x8x128xf32>
      tpu.vector_store %arg3[%c0_15, %c0_16, %c0_17], %20 {strides = array<i32>} : memref<1x8x128xf32, #tpu.memory_space<vmem>>, vector<1x8x128xf32>,
      %c0_18 = arith.constant 0 : index
      %c0_19 = arith.constant 0 : index
      %21 = vector.load %arg6[%c0_18, %c0_19] : memref<8x128xf32, #tpu.memory_space<vmem>>, vector<8x128xf32>
      %c0_20 = arith.constant 0 : index
      %c0_21 = arith.constant 0 : index
      %c0_22 = arith.constant 0 : index
      %22 = vector.load %arg4[%c0_20, %c0_21, %c0_22] : memref<1x8x128xf32, #tpu.memory_space<vmem>>, vector<1x8x128xf32>
      %23 = vector.shape_cast %22 : vector<1x8x128xf32> to vector<8x128xf32>
      %24 = vector.shape_cast %21 : vector<8x128xf32> to vector<1x8x128xf32>
      tpu.vector_store %arg4[%c0_20, %c0_21, %c0_22], %24 {strides = array<i32>} : memref<1x8x128xf32, #tpu.memory_space<vmem>>, vector<1x8x128xf32>,
    } else {
    }
    return
  }
  func.func @transform_0(%arg0: i32, %arg1: i32) -> (i32, i32) {
    %c1_i32 = arith.constant 1 : i32
    %0 = arith.muli %arg0, %c1_i32 : i32
    %1 = arith.addi %0, %arg1 : i32
    %c0_i32 = arith.constant 0 : i32
    %2 = arith.minsi %1, %c0_i32 : i32
    %c0_i32_0 = arith.constant 0 : i32
    %c0_i32_1 = arith.constant 0 : i32
    return %2, %c0_i32_0 : i32, i32
  }
  func.func @transform_1(%arg0: i32, %arg1: i32) -> (i32, i32, i32) {
    %c0_i32 = arith.constant 0 : i32
    %c0_i32_0 = arith.constant 0 : i32
    %c0_i32_1 = arith.constant 0 : i32
    return %arg0, %c0_i32, %c0_i32_0 : i32, i32, i32
  }
  func.func @transform_2(%arg0: i32, %arg1: i32) -> (i32, i32, i32) {
    %c0_i32 = arith.constant 0 : i32
    %c0_i32_0 = arith.constant 0 : i32
    %c0_i32_1 = arith.constant 0 : i32
    return %arg0, %c0_i32, %c0_i32_0 : i32, i32, i32
  }
}

</mosaic_0001>

<bundles_post_ra>
// kernel: _info_minmax.1
= control target key start
LH: loop header
LB: loop body
LE: loop exit
PB: predicated region body
PF: predicated region fallthrough
CT: control target
= control target key end

     0   :  { %s106_s0 = inlined_call_operand.vmem [shape: f32[16,128], index: 0, kind: input, shape index: {}]   ;;  %s107_s1 = inlined_call_operand.vmem [shape: f32[1,8,128], index: 1, kind: output, shape index: {0}]   ;;  %s108_s2 = inlined_call_operand.vmem [shape: f32[1,8,128], index: 2, kind: output, shape index: {1}]  }
   0x1   :  { %v48_v0 = vld [vmem:[%s106_s0] sm:$0xff]  ;;  %v49_v1 = vld [vmem:[%s106_s0 + $0x8] sm:$0xff] }
   0x2   :  { %v51_v2 = vmin.f32 %v48_v0, %v49_v1  ;;  %v55_v3 = vmax.f32 %v48_v0, %v49_v1 }
   0x4   :  { %62 = vst [vmem:[%s107_s1] sm:$0xff] %v51_v2  ;;  %64 = vst [vmem:[%s108_s2] sm:$0xff] %v55_v3 }

</bundles_post_ra>
